<compile_context>
chip_gen: v7x
topology: tpu7x:2x2x1
jax: 0.10.0
libtpu: 0.0.40
codegen_flags: <defaults>
</compile_context>

<pallas_src>
import jax
import jax.numpy as jnp
import numpy as np
from jax.experimental import pallas as pl
from jax.experimental.pallas import tpu as pltpu

INPUT_SIZE = 32            # = dim(t) + dim(v)
T_SIZE = INPUT_SIZE // 2
V_SIZE = INPUT_SIZE - T_SIZE
HIDDEN = 32
NUM_HEADS = 3
HN = HIDDEN * NUM_HEADS    # 96

MATMUL_DTYPE = jnp.float32


def mha_kernel(t_ref, v_ref, wt_ref, wv_ref, b_ref, out_ref):
    # seq_len == 1 => softmax == 1.0 exactly and context == value projection, so the
    # q/k projections, score matmul and softmax are dead compute and omitted.  The
    # value and output projections are pre-fused into wt/wv/b (see wrapper).
    t = t_ref[...].astype(MATMUL_DTYPE)
    v = v_ref[...].astype(MATMUL_DTYPE)
    out = (jnp.dot(t, wt_ref[...].astype(MATMUL_DTYPE),
                   preferred_element_type=jnp.float32)
           + jnp.dot(v, wv_ref[...].astype(MATMUL_DTYPE),
                     preferred_element_type=jnp.float32)
           + b_ref[...])
    out_ref[...] = out.astype(out_ref.dtype)


def _round_up(x, m):
    return ((x + m - 1) // m) * m


def _pick_pack(b):
    # Largest lane-packing factor that divides the batch (8 -> 128-lane inputs,
    # 256-lane outputs).  Falls back gracefully for awkward batch sizes.
    for p in (8, 4, 2, 1):
        if b % p == 0:
            return p
    return 1


def mha_forward(t_in, v_in, params, *, block_b=8192):
    """Batch-tiled pallas_call with lane-packed I/O and a fused (Wv@Wo) weight."""
    b = t_in.shape[0]
    pack = _pick_pack(b)
    rows = b // pack

    # Free row-major reshapes: fold `pack` consecutive batch rows into the lane axis.
    t_p = t_in.reshape(rows, pack * T_SIZE)
    v_p = v_in.reshape(rows, pack * V_SIZE)

    # Fuse the two linears, then block-diagonal-replicate for the packed layout.
    w_fused = params["wv"] @ params["wo"]                     # (32, 32)
    b_fused = params["bv"] @ params["wo"] + params["bo"]      # (1, 32)
    eye = jnp.eye(pack, dtype=w_fused.dtype)
    wt_bd = jnp.kron(eye, w_fused[:T_SIZE, :])                # (pack*16, pack*32)
    wv_bd = jnp.kron(eye, w_fused[T_SIZE:, :])                # (pack*16, pack*32)
    b_bd = jnp.tile(b_fused, (1, pack))                       # (1, pack*32)

    # Batch tile: large (amortizes ~0.35us/step overhead), sublane-aligned, and capped
    # so the "parallel" grid has >= 2 steps (both v7x TensorCores) when work permits.
    block_rows = max(8, block_b // pack)
    if rows >= 16:
        tile_rows = min(block_rows, _round_up(pl.cdiv(rows, 2), 8))
    else:
        tile_rows = rows                                      # whole (tiny) batch at once
    grid = (pl.cdiv(rows, tile_rows),)

    def full(shape):                                          # weights: same block each step
        return pl.BlockSpec(shape, lambda i: (0,) * len(shape))

    weight_bytes = 4 * (wt_bd.size + wv_bd.size + b_bd.size)
    cost = pl.CostEstimate(
        flops=2 * b * INPUT_SIZE * INPUT_SIZE,
        transcendentals=0,
        bytes_accessed=(t_in.dtype.itemsize * b * T_SIZE
                        + v_in.dtype.itemsize * b * V_SIZE
                        + 4 * b * INPUT_SIZE + weight_bytes),
    )

    out_p = pl.pallas_call(
        mha_kernel,
        out_shape=jax.ShapeDtypeStruct((rows, pack * INPUT_SIZE), jnp.float32),
        grid=grid,
        in_specs=[
            pl.BlockSpec((tile_rows, pack * T_SIZE), lambda i: (i, 0)),
            pl.BlockSpec((tile_rows, pack * V_SIZE), lambda i: (i, 0)),
            full(wt_bd.shape),
            full(wv_bd.shape),
            full(b_bd.shape),
        ],
        out_specs=pl.BlockSpec((tile_rows, pack * INPUT_SIZE), lambda i: (i, 0)),
        compiler_params=pltpu.CompilerParams(
            dimension_semantics=("parallel",),       # batch axis -> megacore sharding
            vmem_limit_bytes=32 * 1024 * 1024,
        ),
        cost_estimate=cost,
    )(t_p, v_p, wt_bd, wv_bd, b_bd)

    return out_p.reshape(b, INPUT_SIZE)               # free row-major reshape back


def init_params(key):
    # TODO(synk): Linear_fw's MAML "fast weight" bookkeeping has no forward effect;
    # plain Linear parameters are used (deterministic synthetic init). q/k params are
    # created for reference parity but do not affect the output (seq_len == 1).
    ks = jax.random.split(key, 8)
    s_in = 1.0 / np.sqrt(INPUT_SIZE)
    s_hn = 1.0 / np.sqrt(HN)
    return {
        "wq": jax.random.uniform(ks[0], (INPUT_SIZE, HN), jnp.float32, -s_in, s_in),
        "bq": jax.random.uniform(ks[1], (1, HN), jnp.float32, -s_in, s_in),
        "wk": jax.random.uniform(ks[2], (INPUT_SIZE, HN), jnp.float32, -s_in, s_in),
        "bk": jax.random.uniform(ks[3], (1, HN), jnp.float32, -s_in, s_in),
        "wv": jax.random.uniform(ks[4], (INPUT_SIZE, HN), jnp.float32, -s_in, s_in),
        "bv": jax.random.uniform(ks[5], (1, HN), jnp.float32, -s_in, s_in),
        "wo": jax.random.uniform(ks[6], (HN, INPUT_SIZE), jnp.float32, -s_hn, s_hn),
        "bo": jax.random.uniform(ks[7], (1, INPUT_SIZE), jnp.float32, -s_hn, s_hn),
    }


def mha_reference(t_in, v_in, p):
    # Pure-JAX replica of the full PyTorch forward (including the dead q/k/softmax path).
    x = jnp.concatenate([t_in, v_in], axis=1)[:, None, :]               # (B,1,D)
    b = x.shape[0]
    q = (x @ p["wq"] + p["bq"]).reshape(b, 1, HIDDEN, NUM_HEADS).transpose(0, 2, 1, 3)
    k = (x @ p["wk"] + p["bk"]).reshape(b, 1, HIDDEN, NUM_HEADS).transpose(0, 2, 1, 3)
    v = (x @ p["wv"] + p["bv"]).reshape(b, 1, HIDDEN, NUM_HEADS).transpose(0, 2, 1, 3)
    scores = (q @ k.transpose(0, 1, 3, 2)) / jnp.sqrt(jnp.float32(HIDDEN))
    attn = jax.nn.softmax(scores, axis=-1)
    ctx = attn @ v                                                      # (B,H,1,NH)
    ctx = ctx.transpose(0, 2, 1, 3).reshape(b, 1, HN)
    out = ctx @ p["wo"] + p["bo"]
    return out[:, 0, :]


if __name__ == "__main__":
    key = jax.random.PRNGKey(0)
    k_t, k_v, k_p = jax.random.split(key, 3)
    params = init_params(k_p)

    # Small case (B=2): single grid step, pack=2.
    B = 2
    t_in = jax.random.normal(k_t, (B, T_SIZE), jnp.float32)
    v_in = jax.random.normal(k_v, (B, V_SIZE), jnp.float32)
    out = jax.block_until_ready(mha_forward(t_in, v_in, params))
    ref = jax.block_until_ready(mha_reference(t_in, v_in, params))
    np.testing.assert_allclose(np.asarray(out), np.asarray(ref), rtol=1e-5, atol=1e-5)
    assert out.shape == (B, INPUT_SIZE)

    # Larger batch exercises the lane-dense packed layout and the multi-step grid.
    B2 = 512
    t2 = jax.random.normal(jax.random.PRNGKey(1), (B2, T_SIZE), jnp.float32)
    v2 = jax.random.normal(jax.random.PRNGKey(2), (B2, V_SIZE), jnp.float32)
    out2 = jax.block_until_ready(mha_forward(t2, v2, params))
    ref2 = jax.block_until_ready(mha_reference(t2, v2, params))
    np.testing.assert_allclose(np.asarray(out2), np.asarray(ref2), rtol=1e-5, atol=1e-5)

    print("KERNEL_OK")
</pallas_src>

<mosaic_0001>
module attributes {stable_mosaic.version = 11 : i64} {
  func.func @mha_kernel(%arg0: i32, %arg1: memref<1x32xf32, #tpu.memory_space<vmem>>, %arg2: memref<1x32xf32, #tpu.memory_space<vmem>>, %arg3: memref<32x64xf32, #tpu.memory_space<vmem>>, %arg4: memref<32x64xf32, #tpu.memory_space<vmem>>, %arg5: memref<1x64xf32, #tpu.memory_space<vmem>>, %arg6: memref<1x64xf32, #tpu.memory_space<vmem>>) attributes {dimension_semantics = [#tpu.dimension_semantics<parallel>], iteration_bounds = array<i64: 1>, scalar_prefetch = 0 : i64, scratch_operands = 0 : i64, tpu.core_type = #tpu.core_type<tc>, window_params = [{transform_indices = @transform_0, window_bounds = array<i64: 1, 32>}, {transform_indices = @transform_1, window_bounds = array<i64: 1, 32>}, {pipeline_mode = #tpu.pipeline_mode<synchronous>, transform_indices = @transform_2, window_bounds = array<i64: 32, 64>}, {pipeline_mode = #tpu.pipeline_mode<synchronous>, transform_indices = @transform_3, window_bounds = array<i64: 32, 64>}, {pipeline_mode = #tpu.pipeline_mode<synchronous>, transform_indices = @transform_4, window_bounds = array<i64: 1, 64>}, {transform_indices = @transform_5, window_bounds = array<i64: 1, 64>}]} {
    %c0 = arith.constant 0 : index
    %c0_0 = arith.constant 0 : index
    %0 = vector.load %arg1[%c0, %c0_0] : memref<1x32xf32, #tpu.memory_space<vmem>>, vector<1x32xf32>
    %c0_1 = arith.constant 0 : index
    %c0_2 = arith.constant 0 : index
    %1 = vector.load %arg2[%c0_1, %c0_2] : memref<1x32xf32, #tpu.memory_space<vmem>>, vector<1x32xf32>
    %c0_3 = arith.constant 0 : index
    %c0_4 = arith.constant 0 : index
    %2 = vector.load %arg3[%c0_3, %c0_4] : memref<32x64xf32, #tpu.memory_space<vmem>>, vector<32x64xf32>
    %cst = arith.constant dense<0.000000e+00> : vector<1x64xf32>
    %3 = tpu.matmul %0, %2, %cst {dimension_numbers = #tpu.dot_dimension_numbers<[1], [0], [0], [1], [0, 0, 1, 1], [], []>} : vector<1x32xf32>, vector<32x64xf32>, vector<1x64xf32> -> vector<1x64xf32>
    %c0_5 = arith.constant 0 : index
    %c0_6 = arith.constant 0 : index
    %4 = vector.load %arg4[%c0_5, %c0_6] : memref<32x64xf32, #tpu.memory_space<vmem>>, vector<32x64xf32>
    %cst_7 = arith.constant dense<0.000000e+00> : vector<1x64xf32>
    %5 = tpu.matmul %1, %4, %cst_7 {dimension_numbers = #tpu.dot_dimension_numbers<[1], [0], [0], [1], [0, 0, 1, 1], [], []>} : vector<1x32xf32>, vector<32x64xf32>, vector<1x64xf32> -> vector<1x64xf32>
    %6 = arith.addf %3, %5 : vector<1x64xf32>
    %c0_8 = arith.constant 0 : index
    %c0_9 = arith.constant 0 : index
    %7 = vector.load %arg5[%c0_8, %c0_9] : memref<1x64xf32, #tpu.memory_space<vmem>>, vector<1x64xf32>
    %8 = arith.addf %6, %7 : vector<1x64xf32>
    %c0_10 = arith.constant 0 : index
    %c0_11 = arith.constant 0 : index
    %9 = vector.load %arg6[%c0_10, %c0_11] : memref<1x64xf32, #tpu.memory_space<vmem>>, vector<1x64xf32>
    tpu.vector_store %arg6[%c0_10, %c0_11], %8 {strides = array<i32>} : memref<1x64xf32, #tpu.memory_space<vmem>>, vector<1x64xf32>,
    return
  }
  func.func @transform_0(%arg0: i32) -> (i32, i32) {
    %c0_i32 = arith.constant 0 : i32
    %c0_i32_0 = arith.constant 0 : i32
    return %arg0, %c0_i32 : i32, i32
  }
  func.func @transform_1(%arg0: i32) -> (i32, i32) {
    %c0_i32 = arith.constant 0 : i32
    %c0_i32_0 = arith.constant 0 : i32
    return %arg0, %c0_i32 : i32, i32
  }
  func.func @transform_2(%arg0: i32) -> (i32, i32) {
    %c0_i32 = arith.constant 0 : i32
    %c0_i32_0 = arith.constant 0 : i32
    %c0_i32_1 = arith.constant 0 : i32
    return %c0_i32, %c0_i32_0 : i32, i32
  }
  func.func @transform_3(%arg0: i32) -> (i32, i32) {
    %c0_i32 = arith.constant 0 : i32
    %c0_i32_0 = arith.constant 0 : i32
    %c0_i32_1 = arith.constant 0 : i32
    return %c0_i32, %c0_i32_0 : i32, i32
  }
  func.func @transform_4(%arg0: i32) -> (i32, i32) {
    %c0_i32 = arith.constant 0 : i32
    %c0_i32_0 = arith.constant 0 : i32
    %c0_i32_1 = arith.constant 0 : i32
    return %c0_i32, %c0_i32_0 : i32, i32
  }
  func.func @transform_5(%arg0: i32) -> (i32, i32) {
    %c0_i32 = arith.constant 0 : i32
    %c0_i32_0 = arith.constant 0 : i32
    return %arg0, %c0_i32 : i32, i32
  }
}

</mosaic_0001>

<bundles_post_ra>
// kernel: tpu_custom_call.1
= control target key start
LH: loop header
LB: loop body
LE: loop exit
PB: predicated region body
PF: predicated region fallthrough
CT: control target
= control target key end

     0   :  { %10 = vsyncpa [#allocation3], 0  ;;  %s485_s0 = inlined_call_operand.hbm [shape: f32[1,32], index: 0, kind: input, shape index: {}]   ;;  %s486_s1 = inlined_call_operand.vmem [shape: f32[1,32], index: 1, kind: input, shape index: {}]   ;;  %s487_s2 = inlined_call_operand.hbm [shape: f32[32,64], index: 2, kind: input, shape index: {}]   ;;  %s488_s3 = inlined_call_operand.hbm [shape: f32[32,64], index: 3, kind: input, shape index: {}]   ;;  %s489_s4 = inlined_call_operand.vmem [shape: f32[1,64], index: 4, kind: input, shape index: {}]   ;;  %s490_s5 = inlined_call_operand.hbm [shape: f32[1,64], index: 5, kind: output, shape index: {}]  }
   0x1   :  { %11 = vsyncpa [#allocation6], 0 }
   0x2   :  { %12 = vsyncpa [#allocation4], 0  ;;  %s386_s18 = smov [#allocation5]   ;;  %s292_s22 = scalar_lea.hbm %s487_s2, 512 }
   0x3   :  { %s30_s19 = sshll.u32 %s386_s18, 4  ;;  %p293_p0 = scmp.ne.s32.totalorder %s487_s2, %s292_s22  ;;  %s31_s19 = int_to_ptr.vmem [resolvable:$true] %s30_s19 }
   0x4   :  { %p296_p1 = scmp.lt.u32.totalorder %s292_s22, %s487_s2 }
   0x6   :  { %p298_p2 = pnand %p296_p1, %p293_p0 }
   0x8   :  { %301 = shalt.err (!%p298_p2)
}
   0x9   :  { %s302_s27 = scalar_lea.vmem %s31_s19, 512  ;;  %p307_p4 = scmp.lt.s32.totalorder %s31_s19, %s31_s19 }
   0xa   :  { %p303_p3 = scmp.ne.s32.totalorder %s31_s19, %s302_s27  ;;  %p308_p5 = scmp.lt.s32.totalorder %s302_s27, %s302_s27 }
   0xc   :  { %p309_p6 = por %p308_p5, %p307_p4 }
   0xe   :  { %p310_p7 = pnand %p309_p6, %p303_p3 }
  0x10   :  { %313 = shalt.err (!%p310_p7)
}
  0x11   :  { %s387_s28 = smov 128   ;;  %s388_s29 = smov 8  }
  0x12   :  { %36 = dma.hbm_to_vmem [thread:$0]  %s487_s2, 512, %s31_s19, [#allocation6], %s387_s28, %s387_s28, %s388_s29  }
  0x13   :  { %s389_s7 = smov [#allocation2]   ;;  %s390_s9 = smov [#allocation7]  }
  0x14   :  { %s19_s8 = sshll.u32 %s389_s7, 4  ;;  %s42_s10 = sshll.u32 %s390_s9, 4  ;;  %s20_s8 = int_to_ptr.vmem [resolvable:$true] %s19_s8  ;;  %s43_s10 = int_to_ptr.vmem [resolvable:$true] %s42_s10 }
  0x15   :  { %s314_s13 = scalar_lea.hbm %s485_s0, 16 }
  0x16   :  { %p315_p8 = scmp.ne.s32.totalorder %s485_s0, %s314_s13  ;;  %p318_p9 = scmp.lt.u32.totalorder %s314_s13, %s485_s0 }
  0x18   :  { %p320_p10 = pnand %p318_p9, %p315_p8 }
  0x1a   :  { %323 = shalt.err (!%p320_p10)
}
  0x1b   :  { %s324_s2 = scalar_lea.vmem %s20_s8, 16  ;;  %s328_s18 = scalar_lea.vmem %s20_s8, 32 }
  0x1c   :  { %p325_p11 = scmp.ne.s32.totalorder %s20_s8, %s324_s2  ;;  %p329_p12 = scmp.lt.s32.totalorder %s20_s8, %s20_s8 }
  0x1d   :  { %p330_p13 = scmp.lt.s32.totalorder %s328_s18, %s324_s2 }
  0x1f   :  { %p331_p0 = por %p330_p13, %p329_p12 }
  0x21   :  { %p332_p1 = pnand %p331_p0, %p325_p11 }
  0x23   :  { %335 = shalt.err (!%p332_p1)
}
  0x24   :  { %22 = dma.hbm_to_vmem [thread:$0]  %s485_s0, 16, %s20_s8, [#allocation3]  }
  0x25   :  { %s336_s23 = scalar_lea.hbm %s488_s3, 512 }
  0x26   :  { %p337_p2 = scmp.ne.s32.totalorder %s488_s3, %s336_s23  ;;  %p340_p3 = scmp.lt.u32.totalorder %s336_s23, %s488_s3 }
  0x28   :  { %p342_p4 = pnand %p340_p3, %p337_p2 }
  0x2a   :  { %345 = shalt.err (!%p342_p4)
}
  0x2b   :  { %s346_s30 = scalar_lea.vmem %s43_s10, 512  ;;  %p351_p6 = scmp.lt.s32.totalorder %s43_s10, %s43_s10 }
  0x2c   :  { %p347_p5 = scmp.ne.s32.totalorder %s43_s10, %s346_s30  ;;  %p352_p7 = scmp.lt.s32.totalorder %s346_s30, %s346_s30 }
  0x2e   :  { %p353_p8 = por %p352_p7, %p351_p6 }
  0x30   :  { %p354_p9 = pnand %p353_p8, %p347_p5 }
  0x32   :  { %357 = shalt.err (!%p354_p9)
}
  0x33   :  { %48 = dma.hbm_to_vmem [thread:$0]  %s488_s3, 512, %s43_s10, [#allocation6], %s387_s28, %s387_s28, %s388_s29  }
  0x34   :  { %380 = dma.done.wait [#allocation3], 16  }
  0x35   :  { %381 = vsyncadd [#allocation3], 4294967280 }
  0x36   :  { %382 = dma.done.wait [#allocation6], 1024  }
  0x37   :  { %383 = vsyncadd [#allocation6], 4294966272  ;;  %v391_v0 = vmov 0.0|0.0   ;;  %vm392_vm0 = vmmov 0   ;;  %v393_v1 = vmov 0.0   ;;  %v66_v2 = vld [vmem:[#allocation7] sm:$0xff] }
  0x38   :  { %271 = vmatprep.subr.bf16.mxu0 %v391_v0  ;;  %277 = vmatprep.subr.bf16.mxu1 %v391_v0  ;;  %v67_v3 = vld [vmem:[#allocation7 + $0x8] sm:$0xff]  ;;  %v62_v4 = vld [vmem:[#allocation5] sm:$0xff]  ;;  %v68_v7 = vld [vmem:[#allocation7 + $0x10] sm:$0xff]  ;;  %vm70_vm1 = vcmask 261120   ;;  %s394_s8 = smov [#allocation8]   ;;  %vm219_vm2 = vcmask 516096  }
  0x39   :  { %257 = vmatprep.mubr.msk.f32.mxu0 %vm392_vm0, %v393_v1  ;;  %268 = vmatprep.mubr.msk.f32.mxu1 %vm392_vm0, %v393_v1  ;;  %v272_v5 = vpack.c.bf16 %v67_v3, %v66_v2  ;;  %v63_v6 = vld [vmem:[#allocation5 + $0x8] sm:$0xff]  ;;  %v69_v8 = vld [vmem:[#allocation7 + $0x18] sm:$0xff]  ;;  %v64_v10 = vld [vmem:[#allocation5 + $0x10] sm:$0xff]  ;;  %s227_s9 = sshll.u32 %s394_s8, 4  ;;  %s228_s9 = int_to_ptr.vmem [resolvable:$true] %s227_s9 }
  0x3a   :  { %v278_v9 = vpack.c.bf16 %v63_v6, %v62_v4  ;;  %v65_v11 = vld [vmem:[#allocation5 + $0x18] sm:$0xff]  ;;  %v275_v12 = vpack.c.bf16 %v69_v8, %v68_v7  ;;  %s362_s10 = scalar_lea.vmem %s228_s9, 32  ;;  %p363_p11 = scmp.lt.s32.totalorder %s228_s9, %s228_s9 }
  0x3b   :  { %273 = vmatpush3.bf16.msra.mxu0 %v272_v5  ;;  %v281_v13 = vpack.c.bf16 %v65_v11, %v64_v10  ;;  %v61_v14 = vld [vmem:[%s486_s1] sm:$0x1]  ;;  %s358_s1 = scalar_lea.vmem %s228_s9, 16 }
  0x3c   :  { %279 = vmatpush3.bf16.msra.mxu1 %v278_v9  ;;  %274 = vmatprep.subr.bf16.mxu0 %v391_v0  ;;  %v60_v15 = vld [vmem:[#allocation2] sm:$0x1]  ;;  %p359_p10 = scmp.ne.s32.totalorder %s228_s9, %s358_s1  ;;  %p364_p12 = scmp.lt.s32.totalorder %s362_s10, %s358_s1 }
  0x3d   :  { %280 = vmatprep.subr.bf16.mxu1 %v391_v0  ;;  %v217_v18 = vld [vmem:[%s489_s4] sm:$0x1] }
  0x3e   :  { %p365_p13 = por %p364_p12, %p363_p11 }
  0x3f   :  { %276 = vmatpush3.bf16.msra.mxu0 %v275_v12 }
  0x40   :  { %282 = vmatpush3.bf16.msra.mxu1 %v281_v13  ;;  %p366_p0 = pnand %p365_p13, %p359_p10 }
  0x42   :  { %258 = vmatmul.mubr.msk.f32.vlgmr.msra.gmra.mrb[0].mxu0 %vm70_vm1, %v61_v14 }
  0x43   :  { %269 = vmatmul.mubr.msk.f32.vlgmr.msra.gmra.mrb[0].mxu1 %vm70_vm1, %v60_v15 }
 0x115   :  { %v140_v16 = vpop.f32.mrb[0].mxu0 }
 0x116   :  { %v213_v17 = vpop.f32.mrb[0].mxu1  ;;  %v259_v19 = vpop.f32.mrb[1].mxu0 }
 0x117   :  { %v214_v20 = vadd.f32 %v213_v17, %v140_v16  ;;  %v270_v21 = vpop.f32.mrb[1].mxu1 }
 0x119   :  { %v218_v22 = vadd.f32 %v217_v18, %v214_v20 }
 0x11b   :  { %220 = vst.msk [vmem:[#allocation8] sm:$0x1] %vm219_vm2, %v218_v22 }
 0x11c   :  { %369 = shalt.err (!%p366_p0)
}
 0x11d   :  { %s370_s4 = scalar_lea.hbm %s490_s5, 16 }
 0x11e   :  { %p371_p1 = scmp.ne.s32.totalorder %s490_s5, %s370_s4  ;;  %p374_p2 = scmp.lt.u32.totalorder %s370_s4, %s490_s5 }
 0x120   :  { %p376_p3 = pnand %p374_p2, %p371_p1 }
 0x122   :  { %379 = shalt.err (!%p376_p3)
}
 0x123   :  { %230 = dma.vmem_to_hbm [thread:$0]  %s228_s9, 16, %s490_s5, [#allocation4]  }
 0x124   :  { %384 = dma.done.wait [#allocation4], 16  }
 0x125   :  { %385 = vsyncadd [#allocation4], 4294967280 }
 0x126   :  { %234 = vsyncpa [#allocation3], 1 }
 0x127   :  { %235 = vsyncpa [#allocation6], 1 }
 0x128   :  { %236 = vsyncpa [#allocation4], 1 }

</bundles_post_ra>
